<compile_context>
chip_gen: v7x
topology: tpu7x:2x2x1
jax: 0.10.0
libtpu: 0.0.40
codegen_flags: <defaults>
</compile_context>

<pallas_src>
import functools
import math

import jax
import jax.numpy as jnp
from jax.experimental import pallas as pl
from jax.experimental.pallas import tpu as pltpu


def _round_up(a, b):
    return ((a + b - 1) // b) * b


def _layernorm_kernel(x_ref, g_ref, b_ref, o_ref, *, eps, feat, feat_p):
    # x_ref: (row_tile, feat_p)   g_ref/b_ref: (1, feat_p) f32
    x = x_ref[...].astype(jnp.float32)
    inv_n = jnp.float32(1.0 / feat)

    if feat_p != feat:
        # Feature axis is lane-padded: mask padding out of the reductions.
        mask = jax.lax.broadcasted_iota(jnp.int32, (1, feat_p), 1) < feat
        x = jnp.where(mask, x, 0.0)
        mean = jnp.sum(x, axis=-1, keepdims=True) * inv_n
        xc = jnp.where(mask, x - mean, 0.0)
    else:
        mean = jnp.sum(x, axis=-1, keepdims=True) * inv_n
        xc = x - mean

    var = jnp.sum(xc * xc, axis=-1, keepdims=True) * inv_n
    y = xc * jax.lax.rsqrt(var + eps)
    o_ref[...] = (g_ref[...] * y + b_ref[...]).astype(o_ref.dtype)


def _choose_row_tile(rows, feat_p, itemsize):
    """Pick a row tile sized against a ~2 MiB VMEM block budget."""
    sub = 16 if itemsize == 2 else 8          # bf16 packs 2 rows / sublane
    target_block_bytes = 2 * 1024 * 1024      # ~2 MiB input block
    tile = max(sub, (target_block_bytes // max(1, feat_p * itemsize)) // sub * sub)

    rows_sub = _round_up(rows, sub)
    tile = min(tile, rows_sub)
    # Keep >= 2 grid steps when there is enough work so the row axis can be
    # sharded across the 2 TensorCores on v7x (no-op on v5e/v6e).
    if rows_sub >= 2 * sub:
        tile = min(tile, _round_up((rows_sub + 1) // 2, sub))

    rows_pad = _round_up(rows, tile)
    return tile, rows_pad


def layer_norm(x, gamma, beta, parameters_shape, eps=1e-5):
    """LayerNorm over the trailing `len(parameters_shape)` dims of x."""
    n_norm = len(parameters_shape)
    feat = math.prod(x.shape[-n_norm:])
    rows = math.prod(x.shape[:-n_norm]) if x.shape[:-n_norm] else 1

    x2 = x.reshape(rows, feat)
    g2 = gamma.reshape(1, feat).astype(jnp.float32)
    b2 = beta.reshape(1, feat).astype(jnp.float32)

    itemsize = jnp.dtype(x.dtype).itemsize
    feat_p = _round_up(feat, 128)                 # lane-dense feature axis
    row_tile, rows_pad = _choose_row_tile(rows, feat_p, itemsize)

    if rows_pad != rows or feat_p != feat:
        x2 = jnp.pad(x2, ((0, rows_pad - rows), (0, feat_p - feat)))
    if feat_p != feat:
        g2 = jnp.pad(g2, ((0, 0), (0, feat_p - feat)))
        b2 = jnp.pad(b2, ((0, 0), (0, feat_p - feat)))

    grid = (rows_pad // row_tile,)
    kernel = functools.partial(
        _layernorm_kernel, eps=eps, feat=feat, feat_p=feat_p)

    out = pl.pallas_call(
        kernel,
        out_shape=jax.ShapeDtypeStruct((rows_pad, feat_p), x.dtype),
        grid_spec=pltpu.PrefetchScalarGridSpec(
            num_scalar_prefetch=0,
            grid=grid,
            in_specs=[
                pl.BlockSpec((row_tile, feat_p), lambda i: (i, 0)),
                pl.BlockSpec((1, feat_p), lambda i: (0, 0)),
                pl.BlockSpec((1, feat_p), lambda i: (0, 0)),
            ],
            out_specs=pl.BlockSpec((row_tile, feat_p), lambda i: (i, 0)),
        ),
        compiler_params=pltpu.CompilerParams(
            dimension_semantics=("parallel",),
            # Cover double-buffered input/output blocks + f32 temporaries.
            # 40 MiB is safe on every generation (v7x has 64 MiB physical).
            vmem_limit_bytes=40 * 1024 * 1024,
        ),
    )(x2, g2, b2)

    if rows_pad != rows or feat_p != feat:
        out = out[:rows, :feat]
    return out.reshape(x.shape)


def _reference(x, gamma, beta, parameters_shape, eps):
    n_norm = len(parameters_shape)
    dims = tuple(range(x.ndim - n_norm, x.ndim))
    mean = jnp.mean(x, axis=dims, keepdims=True)
    var = jnp.mean((x - mean) ** 2, axis=dims, keepdims=True)
    return gamma * ((x - mean) / jnp.sqrt(var + eps)) + beta


if __name__ == "__main__":
    eps = 1e-5
    key = jax.random.PRNGKey(0)

    # Main demo: module config parameters_shape = (hidden,), hidden = 32.
    batch, seq, hidden = 2, 8, 32
    parameters_shape = (hidden,)
    x = jax.random.normal(key, (batch, seq, hidden), dtype=jnp.float32)
    gamma = jnp.ones(parameters_shape, dtype=jnp.float32)   # nn.Parameter(ones)
    beta = jnp.zeros(parameters_shape, dtype=jnp.float32)   # nn.Parameter(zeros)

    out = layer_norm(x, gamma, beta, parameters_shape, eps=eps)
    out = jax.block_until_ready(out)
    ref = _reference(x, gamma, beta, parameters_shape, eps)
    assert jnp.allclose(out, ref, atol=1e-5, rtol=1e-5)

    # Padding-path check: rows not a multiple of 8, feat not a multiple of 128.
    x2 = jax.random.normal(jax.random.PRNGKey(1), (3, 5, 160), dtype=jnp.float32)
    g2 = jnp.ones((160,), dtype=jnp.float32)
    b2 = jnp.zeros((160,), dtype=jnp.float32)
    out2 = jax.block_until_ready(layer_norm(x2, g2, b2, (160,), eps=eps))
    ref2 = _reference(x2, g2, b2, (160,), eps)
    assert jnp.allclose(out2, ref2, atol=1e-5, rtol=1e-5)

    print("KERNEL_OK")
</pallas_src>

<mosaic_0001>
module attributes {stable_mosaic.version = 11 : i64} {
  func.func @_layernorm_kernel(%arg0: i32, %arg1: memref<8x128xf32, #tpu.memory_space<vmem>>, %arg2: memref<1x128xf32, #tpu.memory_space<vmem>>, %arg3: memref<1x128xf32, #tpu.memory_space<vmem>>, %arg4: memref<8x128xf32, #tpu.memory_space<vmem>>) attributes {dimension_semantics = [#tpu.dimension_semantics<parallel>], iteration_bounds = array<i64: 2>, scalar_prefetch = 0 : i64, scratch_operands = 0 : i64, tpu.core_type = #tpu.core_type<tc>, window_params = [{transform_indices = @transform_0, window_bounds = array<i64: 8, 128>}, {pipeline_mode = #tpu.pipeline_mode<synchronous>, transform_indices = @transform_1, window_bounds = array<i64: 1, 128>}, {pipeline_mode = #tpu.pipeline_mode<synchronous>, transform_indices = @transform_2, window_bounds = array<i64: 1, 128>}, {transform_indices = @transform_3, window_bounds = array<i64: 8, 128>}]} {
    %c0 = arith.constant 0 : index
    %c0_0 = arith.constant 0 : index
    %0 = vector.load %arg1[%c0, %c0_0] : memref<8x128xf32, #tpu.memory_space<vmem>>, vector<8x128xf32>
    %1 = tpu.iota {dimensions = array<i32: 1>} : vector<1x128xi32>
    %c32_i32 = arith.constant 32 : i32
    %2 = vector.broadcast %c32_i32 : i32 to vector<1x128xi32>
    %3 = arith.cmpi slt, %1, %2 : vector<1x128xi32>
    %cst = arith.constant 0.000000e+00 : f32
    %4 = vector.shape_cast %3 : vector<1x128xi1> to vector<1x128xi1>
    %5 = vector.broadcast %4 : vector<1x128xi1> to vector<8x128xi1>
    %6 = vector.broadcast %cst : f32 to vector<8x128xf32>
    %7 = arith.select %5, %0, %6 : vector<8x128xi1>, vector<8x128xf32>
    %cst_1 = arith.constant dense<0.000000e+00> : vector<8xf32>
    %8 = vector.multi_reduction <add>, %7, %cst_1 [1] : vector<8x128xf32> to vector<8xf32>
    %9 = vector.shape_cast %8 : vector<8xf32> to vector<8x1xf32>
    %cst_2 = arith.constant 3.125000e-02 : f32
    %10 = vector.broadcast %cst_2 : f32 to vector<8x1xf32>
    %11 = arith.mulf %9, %10 : vector<8x1xf32>
    %12 = vector.broadcast %11 : vector<8x1xf32> to vector<8x128xf32>
    %13 = arith.subf %7, %12 : vector<8x128xf32>
    %cst_3 = arith.constant 0.000000e+00 : f32
    %14 = vector.shape_cast %3 : vector<1x128xi1> to vector<1x128xi1>
    %15 = vector.broadcast %14 : vector<1x128xi1> to vector<8x128xi1>
    %16 = vector.broadcast %cst_3 : f32 to vector<8x128xf32>
    %17 = arith.select %15, %13, %16 : vector<8x128xi1>, vector<8x128xf32>
    %18 = arith.mulf %17, %17 : vector<8x128xf32>
    %cst_4 = arith.constant dense<0.000000e+00> : vector<8xf32>
    %19 = vector.multi_reduction <add>, %18, %cst_4 [1] : vector<8x128xf32> to vector<8xf32>
    %20 = vector.shape_cast %19 : vector<8xf32> to vector<8x1xf32>
    %cst_5 = arith.constant 3.125000e-02 : f32
    %21 = vector.broadcast %cst_5 : f32 to vector<8x1xf32>
    %22 = arith.mulf %20, %21 : vector<8x1xf32>
    %cst_6 = arith.constant 9.99999974E-6 : f32
    %23 = vector.broadcast %cst_6 : f32 to vector<8x1xf32>
    %24 = arith.addf %22, %23 : vector<8x1xf32>
    %25 = math.rsqrt %24 : vector<8x1xf32>
    %26 = vector.broadcast %25 : vector<8x1xf32> to vector<8x128xf32>
    %27 = arith.mulf %17, %26 : vector<8x128xf32>
    %c0_7 = arith.constant 0 : index
    %c0_8 = arith.constant 0 : index
    %28 = vector.load %arg2[%c0_7, %c0_8] : memref<1x128xf32, #tpu.memory_space<vmem>>, vector<1x128xf32>
    %29 = vector.broadcast %28 : vector<1x128xf32> to vector<8x128xf32>
    %30 = arith.mulf %29, %27 : vector<8x128xf32>
    %c0_9 = arith.constant 0 : index
    %c0_10 = arith.constant 0 : index
    %31 = vector.load %arg3[%c0_9, %c0_10] : memref<1x128xf32, #tpu.memory_space<vmem>>, vector<1x128xf32>
    %32 = vector.broadcast %31 : vector<1x128xf32> to vector<8x128xf32>
    %33 = arith.addf %30, %32 : vector<8x128xf32>
    %c0_11 = arith.constant 0 : index
    %c0_12 = arith.constant 0 : index
    %34 = vector.load %arg4[%c0_11, %c0_12] : memref<8x128xf32, #tpu.memory_space<vmem>>, vector<8x128xf32>
    tpu.vector_store %arg4[%c0_11, %c0_12], %33 {strides = array<i32>} : memref<8x128xf32, #tpu.memory_space<vmem>>, vector<8x128xf32>,
    return
  }
  func.func @transform_0(%arg0: i32) -> (i32, i32) {
    %c0_i32 = arith.constant 0 : i32
    %c0_i32_0 = arith.constant 0 : i32
    return %arg0, %c0_i32 : i32, i32
  }
  func.func @transform_1(%arg0: i32) -> (i32, i32) {
    %c0_i32 = arith.constant 0 : i32
    %c0_i32_0 = arith.constant 0 : i32
    %c0_i32_1 = arith.constant 0 : i32
    return %c0_i32, %c0_i32_0 : i32, i32
  }
  func.func @transform_2(%arg0: i32) -> (i32, i32) {
    %c0_i32 = arith.constant 0 : i32
    %c0_i32_0 = arith.constant 0 : i32
    %c0_i32_1 = arith.constant 0 : i32
    return %c0_i32, %c0_i32_0 : i32, i32
  }
  func.func @transform_3(%arg0: i32) -> (i32, i32) {
    %c0_i32 = arith.constant 0 : i32
    %c0_i32_0 = arith.constant 0 : i32
    return %arg0, %c0_i32 : i32, i32
  }
}

</mosaic_0001>

<bundles_post_ra>
// kernel: tpu_custom_call.1
= control target key start
LH: loop header
LB: loop body
LE: loop exit
PB: predicated region body
PF: predicated region fallthrough
CT: control target
= control target key end

     0   :  { %8 = vsyncpa [#allocation3], 0  ;;  %s655_s0 = inlined_call_operand.hbm [shape: f32[16,128], index: 0, kind: input, shape index: {}]   ;;  %s656_s1 = inlined_call_operand.vmem [shape: f32[1,128], index: 1, kind: input, shape index: {}]   ;;  %s657_s2 = inlined_call_operand.vmem [shape: f32[1,128], index: 2, kind: input, shape index: {}]   ;;  %s658_s3 = inlined_call_operand.hbm [shape: f32[16,128], index: 3, kind: output, shape index: {}]  }
   0x1   :  { %10 = vsyncpa [#allocation3 + $0x1], 0 }
   0x2   :  { %11 = vsyncpa [#allocation4], 0 }
   0x3   :  { %13 = vsyncpa [#allocation4 + $0x1], 0  ;;  %s488_s12 = smov 0   ;;  %s490_s13 = smov 0  }
   0x4   :  { %s492_s14 = smov 0   ;;  %s494_s15 = smov 0  }
   0x5 LB: > { %s509_s16 = sadd.s32 4294967295, %s464_s15   ;;  %s306_s17 = sadd.s32 4294967294, %s464_s15   ;;  %s464_s15 = sphi %s494_s15, %s673_s15   ;;  %s460_s14 = sphi %s492_s14, %s672_s14   ;;  %s456_s13 = sphi %s490_s13, %s671_s13   ;;  %s452_s12 = sphi %s488_s12, %s670_s12  }
   0x6   : > { %s513_s18 = sadd.s32 1, %s464_s15   ;;  %s26_s19 = sadd.s32 1, %s460_s14 }
   0x7   : > { %s23_s20 = ssub.s32 %s464_s15, %s513_s18  ;;  %p33_p0 = scmp.ne.s32.totalorder %s460_s14, %s456_s13 }
   0x8   : > { %p24_p1 = scmp.eq.s32.totalorder %s23_s20, 0  ;;  %p34_p2 = scmp.eq.s32.totalorder %s464_s15, 0 }
   0x9   : > { %p39_p3 = scmp.ne.s32.totalorder %s456_s13, %s452_s12  ;;  %p40_p4 = scmp.eq.s32.totalorder %s509_s16, 0 }
   0xa   : > { %s525_s21 = scalar_select %p24_p1, %s460_s14, %s26_s19  }
   0xb   : > { %p527_p5 = por %p34_p2, %p33_p0  ;;  %p531_p6 = por %p40_p4, %p39_p3 }
   0xc   : > { %p105_p7 = scmp.eq.s32.totalorder %s509_s16, 1  ;;  %p111_p8 = scmp.eq.s32.totalorder %s306_s17, 1 }
   0xd   : > { %p332_p10 = scmp.lt.s32.totalorder %s464_s15, 2  ;;  %s137_s26 = sand.u32 1, %s460_s14  }
   0xe   : > { %p538_p11 = por %p105_p7, %p33_p0  ;;  %p542_p12 = por %p111_p8, %p39_p3 }
   0xf   : > { %s310_s27 = sshll.u32 %s464_s15, 7  ;;  %s309_s28 = sshll.u32 %s137_s26, 3 }
  0x10   : > { %s662_s24 = scalar_select %p538_p11, 1, 0 }
  0x11   : > { %s663_s25 = scalar_select %p542_p12, 1, 0 }
  0x12   : > { %s551_s4 = scalar_lea.hbm %s655_s0, %s310_s27  ;;  %s141_s5 = scalar_lea.vmem [#allocation2], %s309_s28 }
  0x13   : > { %s148_s6 = sshll.u32 %s141_s5, 4  ;;  %p555_p13 = pnand %p332_p10, %p527_p5  ;;  %s559_s6 = int_to_ptr.vmem [resolvable:$true] %s148_s6 }
  0x14   : > { %s138_s8 = scalar_lea.sflag [#allocation3], %s137_s26  ;;  %s368_s9 = scalar_lea.hbm %s551_s4, 128 }
  0x15   : > { %p369_p2 = scmp.ne.s32.totalorder %s551_s4, %s368_s9  ;;  %p370_p3 = pneg %p555_p13 }
  0x16   : > { %s373_s17 = scalar_lea.hbm %s655_s0, 256  ;;  %p374_p5 = scmp.lt.u32.totalorder %s551_s4, %s655_s0 }
  0x17   : > { %p371_p4 = pnand %p370_p3, %p369_p2  ;;  %p375_p8 = scmp.lt.u32.totalorder %s373_s17, %s368_s9 }
  0x18   : > { %p377_p9 = scmp.lt.u32.totalorder %s368_s9, %s551_s4 }
  0x19   : > { %p372_p7 = pneg %p371_p4  ;;  %p376_p10 = por %p375_p8, %p374_p5 }
  0x1b   : > { %p378_p0 = por %p377_p9, %p376_p10 }
  0x1d   : > { %p379_p1 = pnand %p378_p0, %p372_p7 }
  0x1f   : > { %382 = shalt.err (!%p379_p1)
}
  0x20   : > { %s383_s22 = scalar_lea.vmem %s559_s6, 128  ;;  %s466_s26 = smov [#allocation2]  }
  0x21   : > { %p384_p2 = scmp.ne.s32.totalorder %s559_s6, %s383_s22  ;;  %s388_s27 = sshll.u32 %s466_s26, 4  ;;  %s389_s27 = int_to_ptr.vmem [resolvable:$false] %s388_s27 }
  0x22   : > { %s390_s28 = scalar_lea.vmem %s389_s27, 256  ;;  %p391_p11 = scmp.lt.s32.totalorder %s559_s6, %s389_s27 }
  0x23   : > { %p386_p4 = pnand %p384_p2, %p370_p3  ;;  %p392_p5 = scmp.lt.s32.totalorder %s390_s28, %s383_s22 }
  0x25   : > { %p387_p12 = pneg %p386_p4  ;;  %p393_p8 = por %p392_p5, %p391_p11 }
  0x27   : > { %p394_p9 = pnand %p393_p8, %p387_p12 }
  0x29   : > { %397 = shalt.err (!%p394_p9)
}
  0x2a   : > { %327 = dma.hbm_to_vmem [thread:$0]  (!%p555_p13), %s551_s4, 128, %s559_s6, %s138_s8  }
  0x2b   : > { %p665_p0 = scmp.lt.s32.totalorder %s464_s15, 3  ;;  %p666_p1 = scmp.ge.s32.totalorder %s464_s15, 1 }
  0x2d   : > { %p154_p3 = pnand %p666_p1, %p665_p0 }
  0x2e   : > { %s593_s29 = sand.u32 (!%p154_p3), 1, %s456_s13  }
  0x2f   : > { %157 = sbr.rel (%p154_p3) target bundleno = 387 (0x183), region = 32  ;;  %s312_s30 = sshll.u32 (!%p154_p3), %s593_s29, 3 }
  0x30   : > { %s160_s5 = scalar_lea.sflag (!%p154_p3), [#allocation3], %s593_s29  ;;  %s163_s9 = scalar_lea.vmem (!%p154_p3), [#allocation2], %s312_s30 }
  0x36   : > { %443 = dma.done.wait (%p531_p6), %s160_s5, 128  }
  0x37   : > { %445 = vsyncadd (%p531_p6), %s160_s5, 4294967168  ;;  %v187_v0 = vlaneseq  ;;  %v186_v2 = vld [vmem:[%s163_s9] sm:$0xff]  ;;  %s317_s8 = sshll.u32 %s509_s16, 7  ;;  %s185_s10 = scalar_lea.vmem [#allocation5], %s312_s30 }
  0x38   : > { %v314_v13 = vld [vmem:[%s656_s1] ss:$0 sm:$0xff]  ;;  %s236_s11 = sshll.u32 %s185_s10, 4  ;;  %s611_s20 = scalar_lea.hbm %s658_s3, %s317_s8  ;;  %s613_s11 = int_to_ptr.vmem [resolvable:$true] %s236_s11 }
  0x39   : > { %v188_v1 = vand.u32 127, %v187_v0  ;;  %v315_v15 = vld [vmem:[%s657_s2] ss:$0 sm:$0xff]  ;;  %s223_s22 = scalar_lea.sflag [#allocation4], %s593_s29  ;;  %s398_s26 = scalar_lea.vmem %s613_s11, 128 }
  0x3a   : > { %p399_p6 = scmp.ne.s32.totalorder %s613_s11, %s398_s26  ;;  %p667_p11 = scmp.ne.s32.totalorder %s662_s24, 0 }
  0x3b   : > { %vm189_vm0 = vcmp.lt.s32.totalorder %v188_v1, 32  ;;  %s467_s16 = smov [#allocation5]  }
  0x3c   : > { %v192_v3 = vsel %vm189_vm0, %v186_v2, 0.0  ;;  %p400_p12 = pnand %p399_p6, %p667_p11  ;;  %s402_s27 = sshll.u32 %s467_s16, 4  ;;  %s403_s27 = int_to_ptr.vmem [resolvable:$false] %s402_s27 }
  0x3d   : > { %193 = vadd.xlane.f32.xlu0 %v192_v3  ;;  %s404_s28 = scalar_lea.vmem %s403_s27, 256  ;;  %p405_p7 = scmp.lt.s32.totalorder %s613_s11, %s403_s27 }
  0x3e   : > { %p401_p13 = pneg %p400_p12  ;;  %p406_p10 = scmp.lt.s32.totalorder %s404_s28, %s398_s26 }
  0x40   : > { %p407_p2 = por %p406_p10, %p405_p7 }
  0x42   : > { %p408_p4 = pnand %p407_p2, %p401_p13 }
  0xca   : > { %v194_v4 = vpop.xlane.xlu0 %193 }
  0xcb   : > { %v195_v5 = vmul.f32 0.03125, %v194_v4 }
  0xcd   : > { %v196_v6 = vsub.f32 %v192_v3, %v195_v5 }
  0xcf   : > { %v197_v7 = vsel %vm189_vm0, %v196_v6, 0.0 }
  0xd0   : > { %v198_v8 = vmul.f32 %v197_v7, %v197_v7 }
  0xd2   : > { %199 = vadd.xlane.f32.xlu0 %v198_v8 }
 0x15f   : > { %v200_v9 = vpop.xlane.xlu0 %199 }
 0x160   : > { %v201_v10 = vmul.f32 0.03125, %v200_v9 }
 0x162   : > { %v202_v11 = vadd.f32 1e-05, %v201_v10 }
 0x164   : > { %366 = vrsqrt.f32 %v202_v11 }
 0x16e   : > { %v367_v12 = vpop.eup %366 }
 0x16f   : > { %v204_v14 = vmul.f32 %v367_v12, %v197_v7 }
 0x171   : > { %v212_v16 = vmul.f32 %v314_v13, %v204_v14 }
 0x173   : > { %v220_v17 = vadd.f32 %v315_v15, %v212_v16 }
 0x175   : > { %221 = vst [vmem:[%s185_s10] sm:$0xff] %v220_v17 }
 0x176   : > { %411 = shalt.err (!%p408_p4)
}
 0x177   : > { %s412_s29 = scalar_lea.hbm %s611_s20, 128  ;;  %s416_s9 = scalar_lea.hbm %s658_s3, 256 }
 0x178   : > { %p413_p5 = scmp.ne.s32.totalorder %s611_s20, %s412_s29  ;;  %p417_p0 = scmp.lt.u32.totalorder %s611_s20, %s658_s3 }
 0x179   : > { %p418_p1 = scmp.lt.u32.totalorder %s416_s9, %s412_s29  ;;  %p420_p6 = scmp.lt.u32.totalorder %s412_s29, %s611_s20 }
 0x17a   : > { %p414_p8 = pnand %p413_p5, %p667_p11 }
 0x17b   : > { %p419_p3 = por %p418_p1, %p417_p0 }
 0x17c   : > { %p415_p9 = pneg %p414_p8 }
 0x17d   : > { %p421_p12 = por %p420_p6, %p419_p3 }
 0x17f   : > { %p422_p13 = pnand %p421_p12, %p415_p9 }
 0x181   : > { %425 = shalt.err (!%p422_p13)
}
 0x182   : > { %322 = dma.vmem_to_hbm [thread:$0]  (%p667_p11), %s613_s11, 128, %s611_s20, %s223_s22  }
 0x183 PF: > { %s248_s6 = sand.u32 1, %s452_s12   ;;  %p668_p7 = scmp.ne.s32.totalorder %s663_s25, 0 }
 0x184   : > { %p669_p10 = scmp.ge.s32.totalorder %s464_s15, 2  ;;  %s249_s7 = scalar_lea.sflag [#allocation4], %s248_s6 }
 0x186   : > { %p329_p2 = pnand %p669_p10, %p668_p7 }
 0x188   : > { %447 = dma.done.wait (!%p329_p2), %s249_s7, 128  }
 0x189   : > { %449 = vsyncadd (!%p329_p2), %s249_s7, 4294967168  ;;  %p16_p4 = scmp.ge.s32.totalorder %s513_s18, 4   ;;  %s670_s12 = smov %s456_s13 }
 0x18a   : > { %s671_s13 = smov %s460_s14  ;;  %s672_s14 = smov %s525_s21 }
 0x18b   : > { %s673_s15 = smov %s513_s18  ;;  %18 = sbr.rel (!%p16_p4) target bundleno = 5 (0x5), region = 77 }
 0x192   :  { %254 = vsyncpa [#allocation3], 1 }
 0x193   :  { %256 = vsyncpa [#allocation3 + $0x1], 1 }
 0x194   :  { %257 = vsyncpa [#allocation4], 1 }
 0x195   :  { %259 = vsyncpa [#allocation4 + $0x1], 1 }

</bundles_post_ra>
